<compile_context>
chip_gen: v5e
topology: v5e:2x2
jax: 0.10.0
libtpu: 0.0.40
codegen_flags: <defaults>
</compile_context>

<pallas_src>
import functools

import jax
import jax.numpy as jnp
from jax.experimental import pallas as pl
from jax.experimental.pallas import tpu as pltpu

_BIG = 1e10
_BIGI = 2 ** 30


def _render_kernel(pb_ref, geom_ref, attr_ref,
                   pack_ref, pix_ref,
                   zmin_ref, fid_ref, gat_ref,
                   *, f_chunk, bg_color):
    """grid = (batch, pixel_tile, face_chunk); face_chunk is the innermost
    ("arbitrary") reduction axis carrying an online z-min in VMEM scratch."""
    BIG = jnp.float32(_BIG)
    BIGI = jnp.int32(_BIGI)
    fstep = pl.program_id(2)

    @pl.when(fstep == 0)
    def _init():
        zmin_ref[...] = jnp.full_like(zmin_ref, BIG)
        fid_ref[...] = jnp.full_like(fid_ref, BIGI)
        gat_ref[...] = jnp.zeros_like(gat_ref)

    pb = pb_ref[...]                     # (8, P)  rows: [px, py, 1, 0, ...]
    g = geom_ref[0]                      # (Fc, 32) 4 groups of 8 lanes
    at = attr_ref[0]                     # (24, Fc) gather table, F on lanes

    # Affine-plane evaluation on the MXU: bary_k(f, p) and z(f, p).
    b0 = jnp.dot(g[:, 0:8], pb, preferred_element_type=jnp.float32)
    b1 = jnp.dot(g[:, 8:16], pb, preferred_element_type=jnp.float32)
    b2 = jnp.dot(g[:, 16:24], pb, preferred_element_type=jnp.float32)
    z = jnp.dot(g[:, 24:32], pb, preferred_element_type=jnp.float32)

    # Inside test as a single min-tree (degenerate / padded faces were given
    # planes that evaluate to -1 -> never inside).
    inside = jnp.minimum(jnp.minimum(b0, b1), b2) >= 0.0
    zmask = jnp.where(inside, z, BIG)

    chunk_zmin = jnp.min(zmask, axis=0, keepdims=True)            # (1, P)
    fid = fstep * f_chunk + jax.lax.broadcasted_iota(
        jnp.int32, (f_chunk, 1), 0)                               # (Fc, 1)
    best_id = jnp.min(jnp.where(zmask == chunk_zmin, fid, BIGI),
                      axis=0, keepdims=True)                      # (1, P)

    # Winner gather: exact one-hot (face ids are unique) (Fc, P) against the
    # (24, Fc) attribute table -> MXU.
    sel = (fid == best_id).astype(jnp.float32)
    gat = jnp.dot(at, sel, preferred_element_type=jnp.float32)    # (24, P)

    # Online merge across face chunks; strict < keeps the lowest face id on
    # ties because chunks are visited in ascending face order (no-hit chunks
    # have chunk_zmin == BIG and never win).
    better = chunk_zmin < zmin_ref[...]
    zmin_ref[...] = jnp.where(better, chunk_zmin, zmin_ref[...])
    fid_ref[...] = jnp.where(better, best_id, fid_ref[...])
    gat_ref[...] = jnp.where(better, gat, gat_ref[...])

    @pl.when(fstep == pl.num_programs(2) - 1)
    def _finalize():
        zmin = zmin_ref[...]
        hit = zmin < BIG
        ga = gat_ref[...]
        px = pb[0:1, :]
        py = pb[1:2, :]
        # Recompute the winner's barycentrics from its gathered plane coeffs.
        wb0 = ga[0:1] * px + ga[1:2] * py + ga[2:3]
        wb1 = ga[3:4] * px + ga[4:5] * py + ga[5:6]
        wb2 = ga[6:7] * px + ga[7:8] * py + ga[8:9]
        # Gouraud interpolation of pre-shaded vertex colors.
        r = wb0 * ga[9:10] + wb1 * ga[12:13] + wb2 * ga[15:16]
        gg = wb0 * ga[10:11] + wb1 * ga[13:14] + wb2 * ga[16:17]
        bb = wb0 * ga[11:12] + wb1 * ga[14:15] + wb2 * ga[17:18]
        one = jnp.float32(1.0)
        pack_ref[0, 0:1, :] = jnp.where(hit, r, jnp.float32(bg_color[0]))
        pack_ref[0, 1:2, :] = jnp.where(hit, gg, jnp.float32(bg_color[1]))
        pack_ref[0, 2:3, :] = jnp.where(hit, bb, jnp.float32(bg_color[2]))
        pack_ref[0, 3:4, :] = jnp.where(hit, one, jnp.float32(0.0))
        pack_ref[0, 4:5, :] = jnp.where(hit, zmin, -one)
        pack_ref[0, 5:6, :] = jnp.where(hit, wb0, -one)
        pack_ref[0, 6:7, :] = jnp.where(hit, wb1, -one)
        pack_ref[0, 7:8, :] = jnp.where(hit, wb2, -one)
        pix_ref[...] = jnp.where(hit, fid_ref[...], -1)[None]


@functools.partial(jax.jit, static_argnames=("p_tile", "f_chunk", "bg_color"))
def _render(pb, geom, attrs, *, p_tile, f_chunk, bg_color):
    B = geom.shape[0]
    Fp = geom.shape[1]
    P_pad = pb.shape[1]
    n_p = P_pad // p_tile
    n_f = Fp // f_chunk

    kernel = functools.partial(_render_kernel, f_chunk=f_chunk, bg_color=bg_color)
    out_shape = (
        jax.ShapeDtypeStruct((B, 8, P_pad), jnp.float32),   # [R,G,B,A,z,b0,b1,b2]
        jax.ShapeDtypeStruct((B, 1, P_pad), jnp.int32),     # pix_to_face (local)
    )
    in_specs = [
        pl.BlockSpec((8, p_tile), lambda b, p, f: (0, p)),          # pixel basis
        pl.BlockSpec((1, f_chunk, 32), lambda b, p, f: (b, f, 0)),  # plane coeffs
        pl.BlockSpec((1, 24, f_chunk), lambda b, p, f: (b, 0, f)),  # gather table
    ]
    out_specs = (
        pl.BlockSpec((1, 8, p_tile), lambda b, p, f: (b, 0, p)),
        pl.BlockSpec((1, 1, p_tile), lambda b, p, f: (b, 0, p)),
    )
    scratch = [
        pltpu.VMEM((1, p_tile), jnp.float32),    # running z-min
        pltpu.VMEM((1, p_tile), jnp.int32),      # running best face id
        pltpu.VMEM((24, p_tile), jnp.float32),   # running gathered attributes
    ]
    return pl.pallas_call(
        kernel,
        out_shape=out_shape,
        grid=(B, n_p, n_f),
        in_specs=in_specs,
        out_specs=out_specs,
        scratch_shapes=scratch,
        compiler_params=pltpu.CompilerParams(
            dimension_semantics=("parallel", "parallel", "arbitrary"),
            vmem_limit_bytes=32 * 1024 * 1024),
    )(pb, geom, attrs)


class MeshRendererWithFragments:
    """JAX/Pallas analogue of pytorch3d.renderer.MeshRendererWithFragments:
    forward = rasterize -> shade, returns (images, fragments)."""

    def __init__(self, image_size=16, focal=1.5, z_offset=3.0,
                 bg_color=(1.0, 1.0, 1.0), ambient=0.3, diffuse=0.7,
                 light_dir=(0.0, 0.0, -1.0), eps=1e-8,
                 p_tile=2048, f_chunk=128):
        self.H = self.W = int(image_size)
        self.focal = float(focal)
        self.z_offset = float(z_offset)
        self.bg_color = tuple(float(c) for c in bg_color)
        self.ambient = float(ambient)
        self.diffuse = float(diffuse)
        self.light_dir = tuple(float(c) for c in light_dir)
        self.eps = float(eps)
        self.p_tile_max = max(128, (int(p_tile) // 128) * 128)
        self.f_chunk_max = max(8, (int(f_chunk) // 8) * 8)

    def __call__(self, verts, faces, vert_colors):
        # verts: (B,V,3) world, faces: (F,3) int32, vert_colors: (B,V,3)
        B, V, _ = verts.shape
        F = faces.shape[0]
        H, W = self.H, self.W
        f32 = jnp.float32

        # --- camera glue (plain JAX): world -> view (push +z), pinhole -> NDC.
        # NOTE: px grows rightward, py grows downward (differs from PyTorch3D's
        # +X-left/+Y-up NDC -> possible mirror/flip of the image axes).
        # TODO(synk): vertices behind the camera (z <= 0) are not clipped.
        vv = verts.at[..., 2].add(self.z_offset)
        x_ndc = self.focal * vv[..., 0] / vv[..., 2]
        y_ndc = self.focal * vv[..., 1] / vv[..., 2]

        fx = x_ndc[:, faces]                       # (B,F,3)
        fy = y_ndc[:, faces]
        fz = vv[..., 2][:, faces]                  # view depth per face vertex
        fcs = vert_colors[:, faces, :]             # (B,F,3,3)
        fvw = vv[:, faces, :]                      # (B,F,3,3) view space

        # flat per-face diffuse shading (single directional light), folded into
        # the per-vertex colors so the kernel only interpolates.
        n = jnp.cross(fvw[:, :, 1] - fvw[:, :, 0], fvw[:, :, 2] - fvw[:, :, 0])
        n = n / (jnp.linalg.norm(n, axis=-1, keepdims=True) + 1e-8)
        n = jnp.where(n[..., 2:3] > 0, -n, n)      # face the camera
        lx, ly, lz = self.light_dir
        ndotl = jnp.maximum(n[..., 0] * lx + n[..., 1] * ly + n[..., 2] * lz, 0.0)
        shade = self.ambient + self.diffuse * ndotl          # (B,F)
        shaded = shade[..., None, None] * fcs                # (B,F,3,3)

        x0, x1, x2 = fx[..., 0], fx[..., 1], fx[..., 2]
        y0, y1, y2 = fy[..., 0], fy[..., 1], fy[..., 2]
        z0, z1, z2 = fz[..., 0], fz[..., 1], fz[..., 2]

        area = (x1 - x0) * (y2 - y0) - (y1 - y0) * (x2 - x0)
        valid = jnp.abs(area) > self.eps
        inv_area = jnp.where(valid, 1.0 / jnp.where(valid, area, 1.0), 0.0)

        # barycentric planes b_k(px,py) = cpx_k*px + cpy_k*py + cc_k
        cpx0, cpy0, cc0 = (y1 - y2) * inv_area, (x2 - x1) * inv_area, (x1 * y2 - x2 * y1) * inv_area
        cpx1, cpy1, cc1 = (y2 - y0) * inv_area, (x0 - x2) * inv_area, (x2 * y0 - x0 * y2) * inv_area
        cpx2, cpy2, cc2 = (y0 - y1) * inv_area, (x1 - x0) * inv_area, (x0 * y1 - x1 * y0) * inv_area
        # degenerate faces: b_k == -1 everywhere -> never inside
        cc0 = jnp.where(valid, cc0, -1.0)
        cc1 = jnp.where(valid, cc1, -1.0)
        cc2 = jnp.where(valid, cc2, -1.0)
        # z plane: z(px,py) = dz*px + ez*py + gz  (== b0*z0 + b1*z1 + b2*z2)
        dz = cpx0 * z0 + cpx1 * z1 + cpx2 * z2
        ez = cpy0 * z0 + cpy1 * z1 + cpy2 * z2
        gz = cc0 * z0 + cc1 * z1 + cc2 * z2

        # --- face chunking: adapt chunk size to small meshes (multiple of 8) --
        F_CHUNK = min(self.f_chunk_max, max(8, ((F + 7) // 8) * 8))
        Fp = ((F + F_CHUNK - 1) // F_CHUNK) * F_CHUNK
        padF = Fp - F

        def padf(a, value=0.0):
            return jnp.pad(a.astype(f32), ((0, 0), (0, padF)),
                           constant_values=value)

        zpad = jnp.zeros((B, Fp), f32)
        # plane coefficients, F on sublanes: (B, Fp, 32) = 4 groups of 8 lanes
        groups = [
            (padf(cpx0), padf(cpy0), padf(cc0, -1.0)),
            (padf(cpx1), padf(cpy1), padf(cc1, -1.0)),
            (padf(cpx2), padf(cpy2), padf(cc2, -1.0)),
            (padf(dz),   padf(ez),   padf(gz)),
        ]
        geom_cols = []
        for (ga, gb, gc) in groups:
            geom_cols += [ga, gb, gc] + [zpad] * 5
        geom = jnp.stack(geom_cols, axis=-1)                 # (B, Fp, 32)

        # gather table, F on lanes: (B, 24, Fp)
        attr_rows = [padf(cpx0), padf(cpy0), padf(cc0, -1.0),
                     padf(cpx1), padf(cpy1), padf(cc1, -1.0),
                     padf(cpx2), padf(cpy2), padf(cc2, -1.0)]
        for k in range(3):
            for c in range(3):
                attr_rows.append(padf(shaded[:, :, k, c]))
        attr_rows += [zpad] * 6
        attrs = jnp.stack(attr_rows, axis=1)                 # (B, 24, Fp)

        # --- pixel basis (hoisted out of the kernel), pixel tiling ----------
        P = H * W
        p_tile = min(self.p_tile_max, ((P + 127) // 128) * 128)
        P_pad = ((P + p_tile - 1) // p_tile) * p_tile
        pidx = jnp.arange(P_pad, dtype=jnp.int32)
        px = ((pidx % W).astype(f32) + 0.5) * (2.0 / W) - 1.0
        py = ((pidx // W).astype(f32) + 0.5) * (2.0 / H) - 1.0
        ones = jnp.ones((P_pad,), f32)
        zrow = jnp.zeros((P_pad,), f32)
        pb = jnp.stack([px, py, ones, zrow, zrow, zrow, zrow, zrow], axis=0)

        out_pack, out_pix = _render(pb, geom, attrs,
                                    p_tile=p_tile, f_chunk=F_CHUNK,
                                    bg_color=self.bg_color)

        # --- unpack to PyTorch3D conventions --------------------------------
        images = jnp.transpose(out_pack[:, 0:4, :P], (0, 2, 1)).reshape(B, H, W, 4)
        zbuf = out_pack[:, 4, :P].reshape(B, H, W, 1)
        bary = jnp.transpose(out_pack[:, 5:8, :P], (0, 2, 1)).reshape(B, H, W, 1, 3)
        pix_local = out_pix[:, 0, :P].reshape(B, H, W, 1)
        offsets = (jnp.arange(B, dtype=jnp.int32) * F)[:, None, None, None]
        pix_to_face = jnp.where(pix_local >= 0, pix_local + offsets, -1)
        fragments = {"pix_to_face": pix_to_face, "zbuf": zbuf,
                     "bary_coords": bary}
        return images, fragments


if __name__ == "__main__":
    key = jax.random.PRNGKey(0)
    B = 2
    # cube mesh: 8 vertices, 12 triangular faces (shared topology per batch)
    verts0 = jnp.array(
        [[x, y, z] for x in (-0.6, 0.6) for y in (-0.6, 0.6) for z in (-0.6, 0.6)],
        dtype=jnp.float32)                                   # (8, 3)
    faces = jnp.array([
        [0, 1, 3], [0, 3, 2],
        [4, 6, 7], [4, 7, 5],
        [0, 4, 5], [0, 5, 1],
        [2, 3, 7], [2, 7, 6],
        [0, 2, 6], [0, 6, 4],
        [1, 5, 7], [1, 7, 3],
    ], dtype=jnp.int32)                                      # (12, 3)

    k1, k2 = jax.random.split(key)
    jitter = 0.05 * jax.random.normal(k1, (B, 8, 3), jnp.float32)
    angles = jnp.array([0.3, 1.0], jnp.float32)

    def rot_y(a):
        c, s = jnp.cos(a), jnp.sin(a)
        return jnp.array([[c, 0.0, s], [0.0, 1.0, 0.0], [-s, 0.0, c]], jnp.float32)

    R = jax.vmap(rot_y)(angles)                              # (B,3,3)
    verts = jnp.einsum("vj,bij->bvi", verts0, R) + jitter    # (B,8,3)
    vert_colors = jax.random.uniform(k2, (B, 8, 3), jnp.float32)

    renderer = MeshRendererWithFragments(image_size=16)
    images, fragments = renderer(verts, faces, vert_colors)
    jax.block_until_ready((images, fragments))

    assert images.shape == (B, 16, 16, 4) and images.dtype == jnp.float32
    assert fragments["pix_to_face"].shape == (B, 16, 16, 1)
    assert fragments["pix_to_face"].dtype == jnp.int32
    assert fragments["zbuf"].shape == (B, 16, 16, 1)
    assert fragments["bary_coords"].shape == (B, 16, 16, 1, 3)
    print("KERNEL_OK")
</pallas_src>

<mosaic_0001>
module attributes {stable_mosaic.version = 11 : i64} {
  func.func @_render_kernel(%arg0: i32, %arg1: i32, %arg2: i32, %arg3: memref<8x256xf32, #tpu.memory_space<vmem>>, %arg4: memref<1x16x32xf32, #tpu.memory_space<vmem>>, %arg5: memref<1x24x16xf32, #tpu.memory_space<vmem>>, %arg6: memref<1x8x256xf32, #tpu.memory_space<vmem>>, %arg7: memref<1x1x256xi32, #tpu.memory_space<vmem>>, %arg8: memref<1x256xf32, #tpu.memory_space<vmem>>, %arg9: memref<1x256xi32, #tpu.memory_space<vmem>>, %arg10: memref<24x256xf32, #tpu.memory_space<vmem>>) attributes {dimension_semantics = [#tpu.dimension_semantics<parallel>, #tpu.dimension_semantics<parallel>, #tpu.dimension_semantics<arbitrary>], iteration_bounds = array<i64: 2, 1, 1>, scalar_prefetch = 0 : i64, scratch_operands = 3 : i64, tpu.core_type = #tpu.core_type<tc>, window_params = [{transform_indices = @transform_0, window_bounds = array<i64: 8, 256>}, {transform_indices = @transform_1, window_bounds = array<i64: 1, 16, 32>}, {transform_indices = @transform_2, window_bounds = array<i64: 1, 24, 16>}, {transform_indices = @transform_3, window_bounds = array<i64: 1, 8, 256>}, {transform_indices = @transform_4, window_bounds = array<i64: 1, 1, 256>}]} {
    %c0_i32 = arith.constant 0 : i32
    %0 = arith.cmpi eq, %arg2, %c0_i32 : i32
    %1 = arith.extui %0 : i1 to i32
    %cst = arith.constant 1.000000e+10 : f32
    %c1073741824_i32 = arith.constant 1073741824 : i32
    %c0_i32_0 = arith.constant 0 : i32
    %2 = arith.cmpi ne, %1, %c0_i32_0 : i32
    scf.if %2 {
      %58 = vector.broadcast %cst : f32 to vector<1x256xf32>
      %c0_35 = arith.constant 0 : index
      %c0_36 = arith.constant 0 : index
      %59 = vector.load %arg8[%c0_35, %c0_36] : memref<1x256xf32, #tpu.memory_space<vmem>>, vector<1x256xf32>
      tpu.vector_store %arg8[%c0_35, %c0_36], %58 {strides = array<i32>} : memref<1x256xf32, #tpu.memory_space<vmem>>, vector<1x256xf32>,
      %60 = vector.broadcast %c1073741824_i32 : i32 to vector<1x256xi32>
      %c0_37 = arith.constant 0 : index
      %c0_38 = arith.constant 0 : index
      %61 = vector.load %arg9[%c0_37, %c0_38] : memref<1x256xi32, #tpu.memory_space<vmem>>, vector<1x256xi32>
      tpu.vector_store %arg9[%c0_37, %c0_38], %60 {strides = array<i32>} : memref<1x256xi32, #tpu.memory_space<vmem>>, vector<1x256xi32>,
      %cst_39 = arith.constant 0.000000e+00 : f32
      %62 = vector.broadcast %cst_39 : f32 to vector<24x256xf32>
      %c0_40 = arith.constant 0 : index
      %c0_41 = arith.constant 0 : index
      %63 = vector.load %arg10[%c0_40, %c0_41] : memref<24x256xf32, #tpu.memory_space<vmem>>, vector<24x256xf32>
      tpu.vector_store %arg10[%c0_40, %c0_41], %62 {strides = array<i32>} : memref<24x256xf32, #tpu.memory_space<vmem>>, vector<24x256xf32>,
    } else {
    }
    %c0 = arith.constant 0 : index
    %c0_1 = arith.constant 0 : index
    %3 = vector.load %arg3[%c0, %c0_1] : memref<8x256xf32, #tpu.memory_space<vmem>>, vector<8x256xf32>
    %c0_2 = arith.constant 0 : index
    %c0_3 = arith.constant 0 : index
    %c0_4 = arith.constant 0 : index
    %4 = vector.load %arg4[%c0_2, %c0_3, %c0_4] : memref<1x16x32xf32, #tpu.memory_space<vmem>>, vector<1x16x32xf32>
    %5 = vector.shape_cast %4 : vector<1x16x32xf32> to vector<16x32xf32>
    %c0_5 = arith.constant 0 : index
    %c0_6 = arith.constant 0 : index
    %c0_7 = arith.constant 0 : index
    %6 = vector.load %arg5[%c0_5, %c0_6, %c0_7] : memref<1x24x16xf32, #tpu.memory_space<vmem>>, vector<1x24x16xf32>
    %7 = vector.shape_cast %6 : vector<1x24x16xf32> to vector<24x16xf32>
    %8 = vector.extract_strided_slice %5 {offsets = [0, 0], sizes = [16, 8], strides = [1, 1]} : vector<16x32xf32> to vector<16x8xf32>
    %cst_8 = arith.constant dense<0.000000e+00> : vector<16x256xf32>
    %9 = tpu.matmul %8, %3, %cst_8 {dimension_numbers = #tpu.dot_dimension_numbers<[1], [0], [0], [1], [0, 0, 1, 1], [], []>} : vector<16x8xf32>, vector<8x256xf32>, vector<16x256xf32> -> vector<16x256xf32>
    %10 = vector.extract_strided_slice %5 {offsets = [0, 8], sizes = [16, 8], strides = [1, 1]} : vector<16x32xf32> to vector<16x8xf32>
    %cst_9 = arith.constant dense<0.000000e+00> : vector<16x256xf32>
    %11 = tpu.matmul %10, %3, %cst_9 {dimension_numbers = #tpu.dot_dimension_numbers<[1], [0], [0], [1], [0, 0, 1, 1], [], []>} : vector<16x8xf32>, vector<8x256xf32>, vector<16x256xf32> -> vector<16x256xf32>
    %12 = vector.extract_strided_slice %5 {offsets = [0, 16], sizes = [16, 8], strides = [1, 1]} : vector<16x32xf32> to vector<16x8xf32>
    %cst_10 = arith.constant dense<0.000000e+00> : vector<16x256xf32>
    %13 = tpu.matmul %12, %3, %cst_10 {dimension_numbers = #tpu.dot_dimension_numbers<[1], [0], [0], [1], [0, 0, 1, 1], [], []>} : vector<16x8xf32>, vector<8x256xf32>, vector<16x256xf32> -> vector<16x256xf32>
    %14 = vector.extract_strided_slice %5 {offsets = [0, 24], sizes = [16, 8], strides = [1, 1]} : vector<16x32xf32> to vector<16x8xf32>
    %cst_11 = arith.constant dense<0.000000e+00> : vector<16x256xf32>
    %15 = tpu.matmul %14, %3, %cst_11 {dimension_numbers = #tpu.dot_dimension_numbers<[1], [0], [0], [1], [0, 0, 1, 1], [], []>} : vector<16x8xf32>, vector<8x256xf32>, vector<16x256xf32> -> vector<16x256xf32>
    %16 = arith.minimumf %9, %11 : vector<16x256xf32>
    %17 = arith.minimumf %16, %13 : vector<16x256xf32>
    %cst_12 = arith.constant 0.000000e+00 : f32
    %18 = vector.broadcast %cst_12 : f32 to vector<16x256xf32>
    %19 = arith.cmpf oge, %17, %18 : vector<16x256xf32>
    %cst_13 = arith.constant 1.000000e+10 : f32
    %20 = vector.broadcast %cst_13 : f32 to vector<16x256xf32>
    %21 = arith.select %19, %15, %20 : vector<16x256xi1>, vector<16x256xf32>
    %cst_14 = arith.constant dense<0x7F800000> : vector<256xf32>
    %22 = vector.multi_reduction <minimumf>, %21, %cst_14 [0] : vector<16x256xf32> to vector<256xf32>
    %23 = vector.shape_cast %22 : vector<256xf32> to vector<1x256xf32>
    %c16_i32 = arith.constant 16 : i32
    %24 = arith.muli %arg2, %c16_i32 : i32
    %25 = tpu.iota {dimensions = array<i32: 0>} : vector<16x1xi32>
    %26 = vector.broadcast %24 : i32 to vector<16x1xi32>
    %27 = arith.addi %26, %25 : vector<16x1xi32>
    %28 = vector.broadcast %23 : vector<1x256xf32> to vector<16x256xf32>
    %29 = arith.cmpf oeq, %21, %28 : vector<16x256xf32>
    %c1073741824_i32_15 = arith.constant 1073741824 : i32
    %30 = vector.shape_cast %27 : vector<16x1xi32> to vector<16x1xi32>
    %31 = vector.broadcast %30 : vector<16x1xi32> to vector<16x256xi32>
    %32 = vector.broadcast %c1073741824_i32_15 : i32 to vector<16x256xi32>
    %33 = arith.select %29, %31, %32 : vector<16x256xi1>, vector<16x256xi32>
    %cst_16 = arith.constant dense<2147483647> : vector<256xi32>
    %34 = vector.multi_reduction <minsi>, %33, %cst_16 [0] : vector<16x256xi32> to vector<256xi32>
    %35 = vector.shape_cast %34 : vector<256xi32> to vector<1x256xi32>
    %36 = vector.broadcast %27 : vector<16x1xi32> to vector<16x256xi32>
    %37 = vector.broadcast %35 : vector<1x256xi32> to vector<16x256xi32>
    %38 = arith.cmpi eq, %36, %37 : vector<16x256xi32>
    %39 = arith.extui %38 : vector<16x256xi1> to vector<16x256xi32>
    %40 = arith.sitofp %39 : vector<16x256xi32> to vector<16x256xf32>
    %cst_17 = arith.constant dense<0.000000e+00> : vector<24x256xf32>
    %41 = tpu.matmul %7, %40, %cst_17 {dimension_numbers = #tpu.dot_dimension_numbers<[1], [0], [0], [1], [0, 0, 1, 1], [], []>} : vector<24x16xf32>, vector<16x256xf32>, vector<24x256xf32> -> vector<24x256xf32>
    %c0_18 = arith.constant 0 : index
    %c0_19 = arith.constant 0 : index
    %42 = vector.load %arg8[%c0_18, %c0_19] : memref<1x256xf32, #tpu.memory_space<vmem>>, vector<1x256xf32>
    %43 = arith.cmpf olt, %23, %42 : vector<1x256xf32>
    %c0_20 = arith.constant 0 : index
    %c0_21 = arith.constant 0 : index
    %44 = vector.load %arg8[%c0_20, %c0_21] : memref<1x256xf32, #tpu.memory_space<vmem>>, vector<1x256xf32>
    %45 = arith.select %43, %23, %44 : vector<1x256xi1>, vector<1x256xf32>
    %c0_22 = arith.constant 0 : index
    %c0_23 = arith.constant 0 : index
    %46 = vector.load %arg8[%c0_22, %c0_23] : memref<1x256xf32, #tpu.memory_space<vmem>>, vector<1x256xf32>
    tpu.vector_store %arg8[%c0_22, %c0_23], %45 {strides = array<i32>} : memref<1x256xf32, #tpu.memory_space<vmem>>, vector<1x256xf32>,
    %c0_24 = arith.constant 0 : index
    %c0_25 = arith.constant 0 : index
    %47 = vector.load %arg9[%c0_24, %c0_25] : memref<1x256xi32, #tpu.memory_space<vmem>>, vector<1x256xi32>
    %48 = arith.select %43, %35, %47 : vector<1x256xi1>, vector<1x256xi32>
    %c0_26 = arith.constant 0 : index
    %c0_27 = arith.constant 0 : index
    %49 = vector.load %arg9[%c0_26, %c0_27] : memref<1x256xi32, #tpu.memory_space<vmem>>, vector<1x256xi32>
    tpu.vector_store %arg9[%c0_26, %c0_27], %48 {strides = array<i32>} : memref<1x256xi32, #tpu.memory_space<vmem>>, vector<1x256xi32>,
    %c0_28 = arith.constant 0 : index
    %c0_29 = arith.constant 0 : index
    %50 = vector.load %arg10[%c0_28, %c0_29] : memref<24x256xf32, #tpu.memory_space<vmem>>, vector<24x256xf32>
    %51 = vector.shape_cast %43 : vector<1x256xi1> to vector<1x256xi1>
    %52 = vector.broadcast %51 : vector<1x256xi1> to vector<24x256xi1>
    %53 = arith.select %52, %41, %50 : vector<24x256xi1>, vector<24x256xf32>
    %c0_30 = arith.constant 0 : index
    %c0_31 = arith.constant 0 : index
    %54 = vector.load %arg10[%c0_30, %c0_31] : memref<24x256xf32, #tpu.memory_space<vmem>>, vector<24x256xf32>
    tpu.vector_store %arg10[%c0_30, %c0_31], %53 {strides = array<i32>} : memref<24x256xf32, #tpu.memory_space<vmem>>, vector<24x256xf32>,
    %c0_i32_32 = arith.constant 0 : i32
    %55 = arith.cmpi eq, %arg2, %c0_i32_32 : i32
    %56 = arith.extui %55 : i1 to i32
    %cst_33 = arith.constant 1.000000e+10 : f32
    %c0_i32_34 = arith.constant 0 : i32
    %57 = arith.cmpi ne, %56, %c0_i32_34 : i32
    scf.if %57 {
      %c0_35 = arith.constant 0 : index
      %c0_36 = arith.constant 0 : index
      %58 = vector.load %arg8[%c0_35, %c0_36] : memref<1x256xf32, #tpu.memory_space<vmem>>, vector<1x256xf32>
      %59 = vector.broadcast %cst_33 : f32 to vector<1x256xf32>
      %60 = arith.cmpf olt, %58, %59 : vector<1x256xf32>
      %c0_37 = arith.constant 0 : index
      %c0_38 = arith.constant 0 : index
      %61 = vector.load %arg10[%c0_37, %c0_38] : memref<24x256xf32, #tpu.memory_space<vmem>>, vector<24x256xf32>
      %62 = vector.extract_strided_slice %3 {offsets = [0, 0], sizes = [1, 256], strides = [1, 1]} : vector<8x256xf32> to vector<1x256xf32>
      %63 = vector.extract_strided_slice %3 {offsets = [1, 0], sizes = [1, 256], strides = [1, 1]} : vector<8x256xf32> to vector<1x256xf32>
      %64 = vector.extract_strided_slice %61 {offsets = [0, 0], sizes = [1, 256], strides = [1, 1]} : vector<24x256xf32> to vector<1x256xf32>
      %65 = arith.mulf %64, %62 : vector<1x256xf32>
      %66 = vector.extract_strided_slice %61 {offsets = [1, 0], sizes = [1, 256], strides = [1, 1]} : vector<24x256xf32> to vector<1x256xf32>
      %67 = arith.mulf %66, %63 : vector<1x256xf32>
      %68 = arith.addf %65, %67 : vector<1x256xf32>
      %69 = vector.extract_strided_slice %61 {offsets = [2, 0], sizes = [1, 256], strides = [1, 1]} : vector<24x256xf32> to vector<1x256xf32>
      %70 = arith.addf %68, %69 : vector<1x256xf32>
      %71 = vector.extract_strided_slice %61 {offsets = [3, 0], sizes = [1, 256], strides = [1, 1]} : vector<24x256xf32> to vector<1x256xf32>
      %72 = arith.mulf %71, %62 : vector<1x256xf32>
      %73 = vector.extract_strided_slice %61 {offsets = [4, 0], sizes = [1, 256], strides = [1, 1]} : vector<24x256xf32> to vector<1x256xf32>
      %74 = arith.mulf %73, %63 : vector<1x256xf32>
      %75 = arith.addf %72, %74 : vector<1x256xf32>
      %76 = vector.extract_strided_slice %61 {offsets = [5, 0], sizes = [1, 256], strides = [1, 1]} : vector<24x256xf32> to vector<1x256xf32>
      %77 = arith.addf %75, %76 : vector<1x256xf32>
      %78 = vector.extract_strided_slice %61 {offsets = [6, 0], sizes = [1, 256], strides = [1, 1]} : vector<24x256xf32> to vector<1x256xf32>
      %79 = arith.mulf %78, %62 : vector<1x256xf32>
      %80 = vector.extract_strided_slice %61 {offsets = [7, 0], sizes = [1, 256], strides = [1, 1]} : vector<24x256xf32> to vector<1x256xf32>
      %81 = arith.mulf %80, %63 : vector<1x256xf32>
      %82 = arith.addf %79, %81 : vector<1x256xf32>
      %83 = vector.extract_strided_slice %61 {offsets = [8, 0], sizes = [1, 256], strides = [1, 1]} : vector<24x256xf32> to vector<1x256xf32>
      %84 = arith.addf %82, %83 : vector<1x256xf32>
      %85 = vector.extract_strided_slice %61 {offsets = [9, 0], sizes = [1, 256], strides = [1, 1]} : vector<24x256xf32> to vector<1x256xf32>
      %86 = arith.mulf %70, %85 : vector<1x256xf32>
      %87 = vector.extract_strided_slice %61 {offsets = [12, 0], sizes = [1, 256], strides = [1, 1]} : vector<24x256xf32> to vector<1x256xf32>
      %88 = arith.mulf %77, %87 : vector<1x256xf32>
      %89 = arith.addf %86, %88 : vector<1x256xf32>
      %90 = vector.extract_strided_slice %61 {offsets = [15, 0], sizes = [1, 256], strides = [1, 1]} : vector<24x256xf32> to vector<1x256xf32>
      %91 = arith.mulf %84, %90 : vector<1x256xf32>
      %92 = arith.addf %89, %91 : vector<1x256xf32>
      %93 = vector.extract_strided_slice %61 {offsets = [10, 0], sizes = [1, 256], strides = [1, 1]} : vector<24x256xf32> to vector<1x256xf32>
      %94 = arith.mulf %70, %93 : vector<1x256xf32>
      %95 = vector.extract_strided_slice %61 {offsets = [13, 0], sizes = [1, 256], strides = [1, 1]} : vector<24x256xf32> to vector<1x256xf32>
      %96 = arith.mulf %77, %95 : vector<1x256xf32>
      %97 = arith.addf %94, %96 : vector<1x256xf32>
      %98 = vector.extract_strided_slice %61 {offsets = [16, 0], sizes = [1, 256], strides = [1, 1]} : vector<24x256xf32> to vector<1x256xf32>
      %99 = arith.mulf %84, %98 : vector<1x256xf32>
      %100 = arith.addf %97, %99 : vector<1x256xf32>
      %101 = vector.extract_strided_slice %61 {offsets = [11, 0], sizes = [1, 256], strides = [1, 1]} : vector<24x256xf32> to vector<1x256xf32>
      %102 = arith.mulf %70, %101 : vector<1x256xf32>
      %103 = vector.extract_strided_slice %61 {offsets = [14, 0], sizes = [1, 256], strides = [1, 1]} : vector<24x256xf32> to vector<1x256xf32>
      %104 = arith.mulf %77, %103 : vector<1x256xf32>
      %105 = arith.addf %102, %104 : vector<1x256xf32>
      %106 = vector.extract_strided_slice %61 {offsets = [17, 0], sizes = [1, 256], strides = [1, 1]} : vector<24x256xf32> to vector<1x256xf32>
      %107 = arith.mulf %84, %106 : vector<1x256xf32>
      %108 = arith.addf %105, %107 : vector<1x256xf32>
      %cst_39 = arith.constant 1.000000e+00 : f32
      %109 = vector.broadcast %cst_39 : f32 to vector<1x256xf32>
      %110 = arith.select %60, %92, %109 : vector<1x256xi1>, vector<1x256xf32>
      %c0_40 = arith.constant 0 : index
      %c0_41 = arith.constant 0 : index
      %c0_42 = arith.constant 0 : index
      %111 = vector.load %arg6[%c0_40, %c0_41, %c0_42] : memref<1x8x256xf32, #tpu.memory_space<vmem>>, vector<1x1x256xf32>
      %112 = vector.shape_cast %111 : vector<1x1x256xf32> to vector<1x256xf32>
      %113 = vector.shape_cast %110 : vector<1x256xf32> to vector<1x1x256xf32>
      tpu.vector_store %arg6[%c0_40, %c0_41, %c0_42], %113 {strides = array<i32>} : memref<1x8x256xf32, #tpu.memory_space<vmem>>, vector<1x1x256xf32>,
      %cst_43 = arith.constant 1.000000e+00 : f32
      %114 = vector.broadcast %cst_43 : f32 to vector<1x256xf32>
      %115 = arith.select %60, %100, %114 : vector<1x256xi1>, vector<1x256xf32>
      %c0_44 = arith.constant 0 : index
      %c1 = arith.constant 1 : index
      %c0_45 = arith.constant 0 : index
      %116 = vector.load %arg6[%c0_44, %c1, %c0_45] : memref<1x8x256xf32, #tpu.memory_space<vmem>>, vector<1x1x256xf32>
      %117 = vector.shape_cast %116 : vector<1x1x256xf32> to vector<1x256xf32>
      %118 = vector.shape_cast %115 : vector<1x256xf32> to vector<1x1x256xf32>
      tpu.vector_store %arg6[%c0_44, %c1, %c0_45], %118 {strides = array<i32>} : memref<1x8x256xf32, #tpu.memory_space<vmem>>, vector<1x1x256xf32>,
      %cst_46 = arith.constant 1.000000e+00 : f32
      %119 = vector.broadcast %cst_46 : f32 to vector<1x256xf32>
      %120 = arith.select %60, %108, %119 : vector<1x256xi1>, vector<1x256xf32>
      %c0_47 = arith.constant 0 : index
      %c2 = arith.constant 2 : index
      %c0_48 = arith.constant 0 : index
      %121 = vector.load %arg6[%c0_47, %c2, %c0_48] : memref<1x8x256xf32, #tpu.memory_space<vmem>>, vector<1x1x256xf32>
      %122 = vector.shape_cast %121 : vector<1x1x256xf32> to vector<1x256xf32>
      %123 = vector.shape_cast %120 : vector<1x256xf32> to vector<1x1x256xf32>
      tpu.vector_store %arg6[%c0_47, %c2, %c0_48], %123 {strides = array<i32>} : memref<1x8x256xf32, #tpu.memory_space<vmem>>, vector<1x1x256xf32>,
      %cst_49 = arith.constant 1.000000e+00 : f32
      %cst_50 = arith.constant 0.000000e+00 : f32
      %124 = vector.broadcast %cst_49 : f32 to vector<1x256xf32>
      %125 = vector.broadcast %cst_50 : f32 to vector<1x256xf32>
      %126 = arith.select %60, %124, %125 : vector<1x256xi1>, vector<1x256xf32>
      %c0_51 = arith.constant 0 : index
      %c3 = arith.constant 3 : index
      %c0_52 = arith.constant 0 : index
      %127 = vector.load %arg6[%c0_51, %c3, %c0_52] : memref<1x8x256xf32, #tpu.memory_space<vmem>>, vector<1x1x256xf32>
      %128 = vector.shape_cast %127 : vector<1x1x256xf32> to vector<1x256xf32>
      %129 = vector.shape_cast %126 : vector<1x256xf32> to vector<1x1x256xf32>
      tpu.vector_store %arg6[%c0_51, %c3, %c0_52], %129 {strides = array<i32>} : memref<1x8x256xf32, #tpu.memory_space<vmem>>, vector<1x1x256xf32>,
      %cst_53 = arith.constant 0.000000e+00 : f32
      %cst_54 = arith.constant 1.000000e+00 : f32
      %130 = arith.subf %cst_53, %cst_54 : f32
      %131 = vector.broadcast %130 : f32 to vector<1x256xf32>
      %132 = arith.select %60, %58, %131 : vector<1x256xi1>, vector<1x256xf32>
      %c0_55 = arith.constant 0 : index
      %c4 = arith.constant 4 : index
      %c0_56 = arith.constant 0 : index
      %133 = vector.load %arg6[%c0_55, %c4, %c0_56] : memref<1x8x256xf32, #tpu.memory_space<vmem>>, vector<1x1x256xf32>
      %134 = vector.shape_cast %133 : vector<1x1x256xf32> to vector<1x256xf32>
      %135 = vector.shape_cast %132 : vector<1x256xf32> to vector<1x1x256xf32>
      tpu.vector_store %arg6[%c0_55, %c4, %c0_56], %135 {strides = array<i32>} : memref<1x8x256xf32, #tpu.memory_space<vmem>>, vector<1x1x256xf32>,
      %cst_57 = arith.constant 0.000000e+00 : f32
      %cst_58 = arith.constant 1.000000e+00 : f32
      %136 = arith.subf %cst_57, %cst_58 : f32
      %137 = vector.broadcast %136 : f32 to vector<1x256xf32>
      %138 = arith.select %60, %70, %137 : vector<1x256xi1>, vector<1x256xf32>
      %c0_59 = arith.constant 0 : index
      %c5 = arith.constant 5 : index
      %c0_60 = arith.constant 0 : index
      %139 = vector.load %arg6[%c0_59, %c5, %c0_60] : memref<1x8x256xf32, #tpu.memory_space<vmem>>, vector<1x1x256xf32>
      %140 = vector.shape_cast %139 : vector<1x1x256xf32> to vector<1x256xf32>
      %141 = vector.shape_cast %138 : vector<1x256xf32> to vector<1x1x256xf32>
      tpu.vector_store %arg6[%c0_59, %c5, %c0_60], %141 {strides = array<i32>} : memref<1x8x256xf32, #tpu.memory_space<vmem>>, vector<1x1x256xf32>,
      %cst_61 = arith.constant 0.000000e+00 : f32
      %cst_62 = arith.constant 1.000000e+00 : f32
      %142 = arith.subf %cst_61, %cst_62 : f32
      %143 = vector.broadcast %142 : f32 to vector<1x256xf32>
      %144 = arith.select %60, %77, %143 : vector<1x256xi1>, vector<1x256xf32>
      %c0_63 = arith.constant 0 : index
      %c6 = arith.constant 6 : index
      %c0_64 = arith.constant 0 : index
      %145 = vector.load %arg6[%c0_63, %c6, %c0_64] : memref<1x8x256xf32, #tpu.memory_space<vmem>>, vector<1x1x256xf32>
      %146 = vector.shape_cast %145 : vector<1x1x256xf32> to vector<1x256xf32>
      %147 = vector.shape_cast %144 : vector<1x256xf32> to vector<1x1x256xf32>
      tpu.vector_store %arg6[%c0_63, %c6, %c0_64], %147 {strides = array<i32>} : memref<1x8x256xf32, #tpu.memory_space<vmem>>, vector<1x1x256xf32>,
      %cst_65 = arith.constant 0.000000e+00 : f32
      %cst_66 = arith.constant 1.000000e+00 : f32
      %148 = arith.subf %cst_65, %cst_66 : f32
      %149 = vector.broadcast %148 : f32 to vector<1x256xf32>
      %150 = arith.select %60, %84, %149 : vector<1x256xi1>, vector<1x256xf32>
      %c0_67 = arith.constant 0 : index
      %c7 = arith.constant 7 : index
      %c0_68 = arith.constant 0 : index
      %151 = vector.load %arg6[%c0_67, %c7, %c0_68] : memref<1x8x256xf32, #tpu.memory_space<vmem>>, vector<1x1x256xf32>
      %152 = vector.shape_cast %151 : vector<1x1x256xf32> to vector<1x256xf32>
      %153 = vector.shape_cast %150 : vector<1x256xf32> to vector<1x1x256xf32>
      tpu.vector_store %arg6[%c0_67, %c7, %c0_68], %153 {strides = array<i32>} : memref<1x8x256xf32, #tpu.memory_space<vmem>>, vector<1x1x256xf32>,
      %c0_69 = arith.constant 0 : index
      %c0_70 = arith.constant 0 : index
      %154 = vector.load %arg9[%c0_69, %c0_70] : memref<1x256xi32, #tpu.memory_space<vmem>>, vector<1x256xi32>
      %c-1_i32 = arith.constant -1 : i32
      %155 = vector.broadcast %c-1_i32 : i32 to vector<1x256xi32>
      %156 = arith.select %60, %154, %155 : vector<1x256xi1>, vector<1x256xi32>
      %157 = vector.shape_cast %156 : vector<1x256xi32> to vector<1x1x256xi32>
      %c0_71 = arith.constant 0 : index
      %c0_72 = arith.constant 0 : index
      %c0_73 = arith.constant 0 : index
      %158 = vector.load %arg7[%c0_71, %c0_72, %c0_73] : memref<1x1x256xi32, #tpu.memory_space<vmem>>, vector<1x1x256xi32>
      tpu.vector_store %arg7[%c0_71, %c0_72, %c0_73], %157 {strides = array<i32>} : memref<1x1x256xi32, #tpu.memory_space<vmem>>, vector<1x1x256xi32>,
    } else {
    }
    return
  }
  func.func @transform_0(%arg0: i32, %arg1: i32, %arg2: i32) -> (i32, i32) {
    %c0_i32 = arith.constant 0 : i32
    %c0_i32_0 = arith.constant 0 : i32
    return %c0_i32, %arg1 : i32, i32
  }
  func.func @transform_1(%arg0: i32, %arg1: i32, %arg2: i32) -> (i32, i32, i32) {
    %c0_i32 = arith.constant 0 : i32
    %c0_i32_0 = arith.constant 0 : i32
    return %arg0, %arg2, %c0_i32 : i32, i32, i32
  }
  func.func @transform_2(%arg0: i32, %arg1: i32, %arg2: i32) -> (i32, i32, i32) {
    %c0_i32 = arith.constant 0 : i32
    %c0_i32_0 = arith.constant 0 : i32
    return %arg0, %c0_i32, %arg2 : i32, i32, i32
  }
  func.func @transform_3(%arg0: i32, %arg1: i32, %arg2: i32) -> (i32, i32, i32) {
    %c0_i32 = arith.constant 0 : i32
    %c0_i32_0 = arith.constant 0 : i32
    return %arg0, %c0_i32, %arg1 : i32, i32, i32
  }
  func.func @transform_4(%arg0: i32, %arg1: i32, %arg2: i32) -> (i32, i32, i32) {
    %c0_i32 = arith.constant 0 : i32
    %c0_i32_0 = arith.constant 0 : i32
    return %arg0, %c0_i32, %arg1 : i32, i32, i32
  }
}

</mosaic_0001>

<bundles_post_ra>
// kernel: _render.1
= control target key start
LH: loop header
LB: loop body
LE: loop exit
PB: predicated region body
PF: predicated region fallthrough
CT: control target
= control target key end

     0   :  { %s1714_s0 = inlined_call_operand.vmem [shape: f32[8,256], index: 0, kind: input, shape index: {}]   ;;  %s1715_s1 = inlined_call_operand.vmem [shape: f32[2,16,32], index: 1, kind: input, shape index: {}]   ;;  %s1716_s2 = inlined_call_operand.vmem [shape: f32[2,24,16], index: 2, kind: input, shape index: {}]   ;;  %s1717_s3 = inlined_call_operand.hbm [shape: f32[2,8,256], index: 3, kind: output, shape index: {0}]   ;;  %s1718_s4 = inlined_call_operand.hbm [shape: s32[2,1,256], index: 4, kind: output, shape index: {1}]  }
   0x1   :  { %1719 = sst [smem:[#allocation11_spill]] %s1714_s0 }
   0x2   :  { %10 = vsyncpa [#allocation6], 0 }
   0x3   :  { %12 = vsyncpa [#allocation6 + $0x1], 0 }
   0x4   :  { %13 = vsyncpa [#allocation8], 0 }
   0x5   :  { %15 = vsyncpa [#allocation8 + $0x1], 0  ;;  %s1412_s15 = smov 0   ;;  %s1414_s16 = smov 0  }
   0x6   :  { %s1416_s17 = smov 0   ;;  %s1418_s18 = smov 0  }
   0x7   :  { %s1420_s19 = smov 0   ;;  %s1422_s20 = smov 0  }
   0x8 LB: > { %s1141_s21 = sadd.s32 4294967295, %s1377_s20   ;;  %s1142_s22 = sadd.s32 4294967294, %s1377_s20   ;;  %s1377_s20 = sphi %s1422_s20, %s21_s20   ;;  %s1373_s19 = sphi %s1420_s19, %s1737_s19   ;;  %s1369_s18 = sphi %s1418_s18, %s1736_s18   ;;  %s1365_s17 = sphi %s1416_s17, %s1735_s17   ;;  %s1361_s16 = sphi %s1414_s16, %s1734_s16   ;;  %s1357_s15 = sphi %s1412_s15, %s1733_s15  }
   0x9   : > { %s40_s23 = sadd.s32 1, %s1373_s19  ;;  %s131_s24 = sadd.s32 1, %s1365_s17 }
   0xa   : > { %p42_p0 = scmp.ge.s32.totalorder %s40_s23, 2  ;;  %p141_p1 = scmp.ne.s32.totalorder %s1365_s17, %s1361_s16 }
   0xb   : > { %p142_p2 = scmp.eq.s32.totalorder %s1141_s21, 1  ;;  %p147_p3 = scmp.ne.s32.totalorder %s1361_s16, %s1357_s15 }
   0xc   : > { %s1739_s23 = smov (%p42_p0, %s40_s23), 0  ;;  %p148_p5 = scmp.eq.s32.totalorder %s1142_s22, 1 }
   0xd   : > { %p1452_p4 = por %p142_p2, %p141_p1  ;;  %s126_s26 = ssub.s32 %s1373_s19, %s1739_s23 }
   0xe   : > { %p1146_p6 = scmp.ge.s32.totalorder %s1377_s20, 1  ;;  %p129_p7 = scmp.eq.s32.totalorder %s126_s26, 0 }
   0xf   : > { %p1459_p8 = por %p148_p5, %p147_p3  ;;  %p227_p9 = scmp.lt.s32.totalorder %s1377_s20, 3 }
  0x10   : > { %s1465_s28 = scalar_select %p129_p7, %s1365_s17, %s131_s24  }
  0x11   : > { %p228_p10 = pnand %p1146_p6, %p227_p9 }
  0x12   : > { %p282_p11 = scmp.lt.s32.totalorder (!%p228_p10), %s1369_s18, 1  ;;  %s1722_s0 = sld [smem:[#allocation11_spill]] (!%p228_p10) }
  0x13   : > { %231 = sbr.rel (%p228_p10) target bundleno = 495 (0x1ef), region = 32  ;;  %s1379_s12 = smov (!%p228_p10), 104  }
  0x14   : > { %s1380_s13 = smov (!%p228_p10), 120   ;;  %s1381_s14 = smov (!%p228_p10), 112  }
  0x15   : > { %s1539_s22 = sand.u32 (!%p228_p10), 1, %s1361_s16  }
  0x16   : > { %s1147_s24 = sshll.u32 (!%p228_p10), %s1539_s22, 4  ;;  %s1148_s6 = sshll.u32 (!%p228_p10), %s1539_s22, 1 }
  0x17   : > { %s1562_s5 = scalar_lea.vmem (!%p228_p10), [#allocation5], %s1147_s24 }
  0x18   : > { %v1471_v0 = vld [vmem:[%s1722_s0] sm:$0xff]  ;;  %v1476_v1 = vld [vmem:[%s1722_s0 + $0x8] sm:$0xff]  ;;  %s1481_s7 = scalar_select %p282_p11, %s1369_s18, 1  ;;  %vm324_vm0 = vcmask 64512   ;;  %v305_v14 = vlaneseq  ;;  %v1382_v16 = vmov 1e+10  }
  0x19   : > { %346 = vmatpush.msra.mxu2 %v1471_v0  ;;  %369 = vmatpush.msra.mxu3 %v1476_v1  ;;  %v1383_v24 = vmov 1073741824   ;;  %vm693_vm14 = vcmask 1040384  }
  0x1a   : > { %454 = vmatpush.msra.mxu0 %v1471_v0  ;;  %477 = vmatpush.msra.mxu1 %v1476_v1  ;;  %s1196_s8 = sshll.u32 %s1481_s7, 4  ;;  %vm1509_vm1 = vcmp.lt.s32.totalorder %v305_v14, 256  ;;  %v1517_v50 = vshrl.u32 %v305_v14, 7  ;;  %s1198_s21 = smul.u32 24, %s1481_s7 }
  0x1b   : > { %423 = vmatpush.msrb.mxu3 %v1476_v1  ;;  %400 = vmatpush.msrb.mxu2 %v1471_v0  ;;  %s289_s11 = scalar_lea.vmem %s1715_s1, %s1196_s8  ;;  %309 = vst.msk [vmem:[#allocation2] sm:$0x3] %vm1509_vm1, %v1382_v16  ;;  %s274_s7 = scalar_lea.vmem [#allocation7], %s1148_s6 }
  0x1c   : > { %v319_v2 = vld [vmem:[%s289_s11] sm:$0xff]  ;;  %v320_v3 = vld [vmem:[%s289_s11 + $0x8] sm:$0xff]  ;;  %310 = vst.msk [vmem:[#allocation3] sm:$0x3] %vm1509_vm1, %v1383_v24  ;;  %v572_v56 = vadd.s32 8, %v1517_v50  ;;  %s1545_s30 = scalar_lea.vmem %s1716_s2, %s1198_s21  ;;  %s1193_s8 = sshll.u32 %s1369_s18, 1 }
  0x1d   : > { %485 = vrot.lane.b32.xlu1 %v319_v2, %s1379_s12  ;;  %377 = vrot.lane.b32.xlu0 %v319_v2, %s1380_s13  ;;  %s989_s11 = scalar_lea.hbm %s1718_s4, %s1193_s8 }
  0x1e   : > { %487 = vrot.lane.b32.xlu2 %v320_v3, %s1379_s12  ;;  %1152 = vmatmul.msk.f32.vlgmr.msra.gmra.mxu2 %vm324_vm0, %v319_v2  ;;  %s991_s12 = sshll.u32 %s274_s7, 4  ;;  %s992_s12 = int_to_ptr.vmem [resolvable:$true] %s991_s12 }
  0x1f   : > { %1154 = vmatmul.msk.f32.vlgmr.msra.gmra.mxu3 %vm324_vm0, %v319_v2  ;;  %508 = vmatpush.msra.mxu2 %v1471_v0 }
  0x20   : > { %531 = vmatpush.msra.mxu3 %v1476_v1 }
  0x22   : > { %v680_v53 = vld [vmem:[#allocation2] sm:$0x3] }
  0x23   : > { %v683_v59 = vperm.slane %v680_v53, 1  ;;  %v682_v60 = vperm.slane %v680_v53, 0 }
  0x25   : > { %431 = vrot.lane.b32.xlu1 %v319_v2, %s1381_s14  ;;  %379 = vrot.lane.b32.xlu0 %v320_v3, %s1380_s13  ;;  %s993_s13 = sshll.u32 %s989_s11, 4  ;;  %s994_s13 = int_to_ptr.hbm [resolvable:$true] %s993_s13 }
  0x26   : > { %433 = vrot.lane.b32.xlu2 %v320_v3, %s1381_s14  ;;  %1153 = vmatmul.msk.f32.gmra.mxu2 %vm324_vm0, %v320_v3  ;;  %s960_s14 = scalar_lea.sflag [#allocation8], %s1539_s22  ;;  %s1281_s21 = sshra.s32 %s994_s13, 4  ;;  %s1282_s21 = int_to_ptr.hbm [resolvable:$true] %s1281_s21 }
  0x27   : > { %1155 = vmatmul.msk.f32.gmra.mxu3 %vm324_vm0, %v320_v3  ;;  %s1283_s24 = scalar_lea.hbm %s1282_s21, 2  ;;  %p1288_p1 = scmp.lt.s32.totalorder %s1282_s21, %s1718_s4 }
  0x28   : > { %p1284_p12 = scmp.ne.s32.totalorder %s1282_s21, %s1283_s24 }
  0x2a   : > { %p1285_p13 = pnand %p1284_p12, %p1452_p4 }
  0x2c   : > { %p1286_p0 = pneg %p1285_p13 }
  0x78   : > { %v488_v6 = vpop.permute.xlu2 %487 }
  0x80   : > { %v434_v9 = vpop.permute.xlu2 %433 }
  0x8f   : > { %v486_v4 = vpop.permute.xlu1 %485  ;;  %v378_v5 = vpop.permute.xlu0 %377 }
  0x90   : > { %1156 = vmatmul.msk.f32.vlgmr.msrb.gmra.mxu2 %vm324_vm0, %v378_v5  ;;  %1158 = vmatmul.msk.f32.vlgmr.msrb.gmra.mxu3 %vm324_vm0, %v378_v5 }
  0x97   : > { %v432_v7 = vpop.permute.xlu1 %431  ;;  %v380_v8 = vpop.permute.xlu0 %379 }
  0x98   : > { %1157 = vmatmul.msk.f32.gmra.mxu2 %vm324_vm0, %v380_v8  ;;  %1159 = vmatmul.msk.f32.gmra.mxu3 %vm324_vm0, %v380_v8 }
  0x99   : > { %1160 = vmatmul.msk.f32.vlgmr.msra.gmra.mxu0 %vm324_vm0, %v432_v7  ;;  %1162 = vmatmul.msk.f32.vlgmr.msra.gmra.mxu1 %vm324_vm0, %v432_v7 }
  0xa0   : > { %1164 = vmatmul.msk.f32.vlgmr.msra.gmra.mxu2 %vm324_vm0, %v486_v4  ;;  %1166 = vmatmul.msk.f32.vlgmr.msra.gmra.mxu3 %vm324_vm0, %v486_v4 }
  0xa1   : > { %1161 = vmatmul.msk.f32.gmra.mxu0 %vm324_vm0, %v434_v9  ;;  %1163 = vmatmul.msk.f32.gmra.mxu1 %vm324_vm0, %v434_v9  ;;  %v348_v10 = vpop.f32.mrf.mxu2 }
  0xa2   : > { %v371_v11 = vpop.f32.mrf.mxu3 }
  0xa8   : > { %1165 = vmatmul.msk.f32.gmra.mxu2 %vm324_vm0, %v488_v6  ;;  %1167 = vmatmul.msk.f32.gmra.mxu3 %vm324_vm0, %v488_v6 }
  0xa9   : > { %v351_v12 = vpop.f32.mrf.mxu2 }
  0xaa   : > { %v374_v13 = vpop.f32.mrf.mxu3 }
 0x113   : > { %v402_v17 = vpop.f32.mrf.mxu2  ;;  %v425_v18 = vpop.f32.mrf.mxu3 }
 0x114   : > { %v539_v23 = vmin.f32 %v348_v10, %v402_v17  ;;  %v540_v25 = vmin.f32 %v371_v11, %v425_v18  ;;  %v701_v18 = vld [vmem:[#allocation3] sm:$0x3] }
 0x116   : > { %v456_v19 = vpop.f32.mrf.mxu0  ;;  %v479_v20 = vpop.f32.mrf.mxu1 }
 0x117   : > { %v543_v32 = vmin.f32 %v539_v23, %v456_v19  ;;  %v544_v33 = vmin.f32 %v540_v25, %v479_v20  ;;  %v703_v23 = vperm.slane %v701_v18, 1 }
 0x119   : > { %vm547_vm2 = vcmp.ge.f32.partialorder %v543_v32, 0.0  ;;  %vm548_vm3 = vcmp.ge.f32.partialorder %v544_v33, 0.0  ;;  %v1385_v32 = vmov 0.0  }
 0x11b   : > { %v405_v21 = vpop.f32.mrf.mxu2  ;;  %v428_v22 = vpop.f32.mrf.mxu3 }
 0x11c   : > { %v541_v26 = vmin.f32 %v351_v12, %v405_v21  ;;  %v542_v27 = vmin.f32 %v374_v13, %v428_v22 }
 0x11e   : > { %v459_v30 = vpop.f32.mrf.mxu0  ;;  %v482_v31 = vpop.f32.mrf.mxu1 }
 0x11f   : > { %v545_v34 = vmin.f32 %v541_v26, %v459_v30  ;;  %v546_v35 = vmin.f32 %v542_v27, %v482_v31  ;;  %v702_v26 = vperm.slane %v701_v18, 0 }
 0x121   : > { %vm549_vm4 = vcmp.ge.f32.partialorder %v545_v34, 0.0  ;;  %vm550_vm5 = vcmp.ge.f32.partialorder %v546_v35, 0.0 }
 0x123   : > { %v510_v28 = vpop.f32.mrf.mxu2  ;;  %v533_v29 = vpop.f32.mrf.mxu3 }
 0x124   : > { %v551_v36 = vsel %vm547_vm2, %v510_v28, 1e+10  ;;  %v552_v39 = vsel %vm548_vm3, %v533_v29, 1e+10  ;;  %v1384_v28 = vmov 1.0   ;;  %v321_v29 = vld [vmem:[%s1545_s30] sm:$0xff] }
 0x12b   : > { %v513_v37 = vpop.f32.mrf.mxu2  ;;  %v536_v38 = vpop.f32.mrf.mxu3 }
 0x12c   : > { %v553_v40 = vsel %vm549_vm4, %v513_v37, 1e+10  ;;  %v554_v41 = vsel %vm550_vm5, %v536_v38, 1e+10  ;;  %v322_v37 = vld [vmem:[%s1545_s30 + $0x8] sm:$0xff] }
 0x12d   : > { %v555_v42 = vmin.f32 %v551_v36, %v553_v40  ;;  %v562_v43 = vmin.f32 %v552_v39, %v554_v41 }
 0x12f   : > { %v556_v44 = vrot.slane %v555_v42, 4  ;;  %v563_v45 = vrot.slane %v562_v43, 4 }
 0x131   : > { %v557_v46 = vmin.f32 %v555_v42, %v556_v44  ;;  %v564_v47 = vmin.f32 %v562_v43, %v563_v45 }
 0x133   : > { %v558_v48 = vrot.slane %v557_v46, 2  ;;  %v565_v49 = vrot.slane %v564_v47, 2 }
 0x135   : > { %v559_v51 = vmin.f32 %v557_v46, %v558_v48  ;;  %v566_v52 = vmin.f32 %v564_v47, %v565_v49 }
 0x137   : > { %v560_v54 = vrot.slane %v559_v51, 1  ;;  %v567_v55 = vrot.slane %v566_v52, 1 }
 0x139   : > { %v561_v57 = vmin.f32 %v559_v51, %v560_v54  ;;  %v568_v58 = vmin.f32 %v566_v52, %v567_v55 }
 0x13b   : > { %vm576_vm6 = vcmp.eq.f32.partialorder %v551_v36, %v561_v57  ;;  %vm578_vm7 = vcmp.eq.f32.partialorder %v553_v40, %v561_v57  ;;  %vm577_vm8 = vcmp.eq.f32.partialorder %v552_v39, %v568_v58  ;;  %vm579_vm9 = vcmp.eq.f32.partialorder %v554_v41, %v568_v58  ;;  %v323_v40 = vld [vmem:[%s1545_s30 + $0x10] sm:$0xff]  ;;  %s1287_s30 = scalar_lea.hbm %s1718_s4, 4 }
 0x13c   : > { %v580_v61 = vsel %vm576_vm6, %v1517_v50, 1073741824  ;;  %v582_v62 = vsel %vm578_vm7, %v572_v56, 1073741824  ;;  %v581_v63 = vsel %vm577_vm8, %v1517_v50, 1073741824  ;;  %v583_v2 = vsel %vm579_vm9, %v572_v56, 1073741824  ;;  %p1289_p2 = scmp.lt.s32.totalorder %s1287_s30, %s1283_s24 }
 0x13d   : > { %vm584_vm10 = vcmp.lt.s32.totalorder %v580_v61, %v582_v62  ;;  %vm595_vm11 = vcmp.lt.s32.totalorder %v581_v63, %v583_v2  ;;  %vm1522_vm12 = vcmp.lt.f32.partialorder %v568_v58, %v683_v59  ;;  %vm1526_vm13 = vcmp.lt.f32.partialorder %v561_v57, %v682_v60 }
 0x13e   : > { %v585_v4 = vsel %vm584_vm10, %v580_v61, %v582_v62  ;;  %v596_v5 = vsel %vm595_vm11, %v581_v63, %v583_v2  ;;  %v689_v9 = vsel %vm1522_vm12, %v568_v58, %v683_v59  ;;  %v688_v11 = vsel %vm1526_vm13, %v561_v57, %v682_v60  ;;  %p1290_p3 = por %p1289_p2, %p1288_p1 }
 0x13f   : > { %v586_v7 = vrot.slane %v585_v4, 4  ;;  %v597_v8 = vrot.slane %v596_v5, 4  ;;  %v692_v10 = vrot.slane %v689_v9, 7  ;;  %vm618_vm9 = vcmask 130048  }
 0x140   : > { %p1291_p5 = pnand %p1290_p3, %p1286_p0 }
 0x141   : > { %vm587_vm15 = vcmp.lt.s32.totalorder %v585_v4, %v586_v7  ;;  %vm598_vm0 = vcmp.lt.s32.totalorder %v596_v5, %v597_v8  ;;  %v694_v14 = vsel %vm693_vm14, %v688_v11, %v692_v10 }
 0x142   : > { %v588_v12 = vsel %vm587_vm15, %v585_v4, %v586_v7  ;;  %v599_v13 = vsel %vm598_vm0, %v596_v5, %v597_v8  ;;  %700 = vst.msk [vmem:[#allocation2] sm:$0x3] %vm1509_vm1, %v694_v14 }
 0x143   : > { %v589_v16 = vrot.slane %v588_v12, 2  ;;  %v600_v17 = vrot.slane %v599_v13, 2 }
 0x145   : > { %vm590_vm2 = vcmp.lt.s32.totalorder %v588_v12, %v589_v16  ;;  %vm601_vm3 = vcmp.lt.s32.totalorder %v599_v13, %v600_v17 }
 0x146   : > { %v591_v19 = vsel %vm590_vm2, %v588_v12, %v589_v16  ;;  %v602_v20 = vsel %vm601_vm3, %v599_v13, %v600_v17 }
 0x147   : > { %v592_v21 = vrot.slane %v591_v19, 1  ;;  %v603_v22 = vrot.slane %v602_v20, 1 }
 0x149   : > { %vm593_vm4 = vcmp.lt.s32.totalorder %v591_v19, %v592_v21  ;;  %vm604_vm5 = vcmp.lt.s32.totalorder %v602_v20, %v603_v22  ;;  %v1547_v27 = vld [vmem:[#allocation2] sm:$0x3] }
 0x14a   : > { %v594_v24 = vsel %vm593_vm4, %v591_v19, %v592_v21  ;;  %v605_v25 = vsel %vm604_vm5, %v602_v20, %v603_v22  ;;  %vm737_vm10 = vcmp.lt.f32.partialorder %v1547_v27, 1e+10 }
 0x14b   : > { %vm608_vm6 = vcmp.eq.s32.totalorder %v572_v56, %v594_v24  ;;  %vm609_vm7 = vcmp.eq.s32.totalorder %v572_v56, %v605_v25  ;;  %vm606_vm8 = vcmp.eq.s32.totalorder %v1517_v50, %v594_v24  ;;  %v705_v30 = vsel %vm1522_vm12, %v605_v25, %v703_v23 }
 0x14c   : > { %1172 = vmatpush.msk.msrb.mxu0 %vm608_vm6, %v1384_v28  ;;  %1177 = vmatpush.msk.msrb.mxu1 %vm609_vm7, %v1384_v28  ;;  %vm607_vm11 = vcmp.eq.s32.totalorder %v1517_v50, %v605_v25  ;;  %v706_v31 = vrot.slane %v705_v30, 7  ;;  %v912_v33 = vsel %vm737_vm10, 1.0, %v1385_v32  ;;  %v916_v34 = vsel %vm737_vm10, %v1547_v27, -1.0 }
 0x14d   : > { %v704_v35 = vsel %vm1526_vm13, %v594_v24, %v702_v26  ;;  %1184 = vst.msk [vmem:[%s1562_s5 + $0x3] ss:$8 sm:$0x3] %vm1509_vm1, %v912_v33 }
 0x14e   : > { %1173 = vmatpush.msk.msrb.mxu0 %vm606_vm8, %v1384_v28  ;;  %1178 = vmatpush.msk.msrb.mxu1 %vm607_vm11, %v1384_v28  ;;  %v707_v36 = vsel %vm693_vm14, %v704_v35, %v706_v31  ;;  %1185 = vst.msk [vmem:[%s1562_s5 + $0x4] ss:$8 sm:$0x3] %vm1509_vm1, %v916_v34 }
 0x14f   : > { %1174 = vmatmul.msk.f32.vlgmr.msrb.gmra.mxu0 %vm618_vm9, %v321_v29  ;;  %1179 = vmatmul.msk.f32.vlgmr.msrb.gmra.mxu1 %vm618_vm9, %v321_v29  ;;  %708 = vst.msk [vmem:[#allocation3] sm:$0x3] %vm1509_vm1, %v707_v36 }
 0x156   : > { %v951_v38 = vld [vmem:[#allocation3] sm:$0x3] }
 0x157   : > { %1175 = vmatmul.msk.f32.gmra.mxu0 %vm618_vm9, %v322_v37  ;;  %1180 = vmatmul.msk.f32.gmra.mxu1 %vm618_vm9, %v322_v37  ;;  %v952_v39 = vsel %vm737_vm10, %v951_v38, 4294967295 }
 0x158   : > { %953 = vst.msk [vmem:[%s274_s7] sm:$0x3] %vm1509_vm1, %v952_v39 }
 0x15f   : > { %1176 = vmatmul.msk.f32.gmra.mxu0 %vm618_vm9, %v323_v40  ;;  %1181 = vmatmul.msk.f32.gmra.mxu1 %vm618_vm9, %v323_v40 }
 0x160   : > { %1294 = shalt.err (!%p1291_p5)
}
 0x161   : > { %1200 = dma.vmem_to_hbm [thread:$0]  (%p1452_p4), %s992_s12, 32, %s994_s13, %s960_s14   ;;  %v1386_v41 = vmov 0   ;;  %v764_v46 = vrot.slane %v1471_v0, 5  ;;  %v780_v47 = vrot.slane %v1471_v0, 2  ;;  %v765_v48 = vrot.slane %v1476_v1, 5 }
 0x162   : > { %v715_v42 = vsel %vm1526_vm13, 1, %v1386_v41  ;;  %v716_v43 = vsel %vm1522_vm12, 1, %v1386_v41  ;;  %v781_v53 = vrot.slane %v1476_v1, 2  ;;  %s1197_s0 = sshll.u32 %s1369_s18, 4  ;;  %s975_s9 = sshll.u32 %s1562_s5, 4  ;;  %s976_s9 = int_to_ptr.vmem [resolvable:$true] %s975_s9 }
 0x163   : > { %v717_v44 = vperm.slane %v715_v42, 0  ;;  %v718_v45 = vperm.slane %v716_v43, 0  ;;  %s973_s8 = scalar_lea.hbm %s1717_s3, %s1197_s0  ;;  %s955_s11 = scalar_lea.sflag [#allocation6], %s1539_s22 }
 0x164   : > { %s977_s10 = sshll.u32 %s973_s8, 4  ;;  %s1315_s24 = scalar_lea.hbm %s1717_s3, 32  ;;  %s978_s10 = int_to_ptr.hbm [resolvable:$true] %s977_s10 }
 0x165   : > { %vm1608_vm15 = vcmp.eq.s32.totalorder %v717_v44, 1  ;;  %vm1612_vm0 = vcmp.eq.s32.totalorder %v718_v45, 1  ;;  %s1309_s12 = sshra.s32 %s978_s10, 4  ;;  %s1310_s12 = int_to_ptr.hbm [resolvable:$true] %s1309_s12 }
 0x166   : > { %s1311_s13 = scalar_lea.hbm %s1310_s12, 16  ;;  %p1316_p10 = scmp.lt.s32.totalorder %s1310_s12, %s1717_s3 }
 0x167   : > { %p1312_p6 = scmp.ne.s32.totalorder %s1310_s12, %s1311_s13  ;;  %p1317_p11 = scmp.lt.s32.totalorder %s1315_s24, %s1311_s13 }
 0x169   : > { %p1313_p7 = pnand %p1312_p6, %p1452_p4  ;;  %p1318_p12 = por %p1317_p11, %p1316_p10 }
 0x16b   : > { %p1314_p9 = pneg %p1313_p7 }
 0x16d   : > { %p1319_p13 = pnand %p1318_p12, %p1314_p9 }
 0x1cc   : > { %v645_v49 = vpop.f32.mrf.mxu0  ;;  %v671_v51 = vpop.f32.mrf.mxu1 }
 0x1cd   : > { %v721_v54 = vsel %vm1608_vm15, %v645_v49, 0.0  ;;  %v722_v55 = vsel %vm1612_vm0, %v671_v51, 0.0 }
 0x1ce   : > { %v744_v56 = vmul.f32 %v721_v54, %v1471_v0  ;;  %v768_v57 = vmul.f32 %v764_v46, %v721_v54  ;;  %v784_v58 = vmul.f32 %v780_v47, %v721_v54  ;;  %v745_v59 = vmul.f32 %v722_v55, %v1476_v1 }
 0x1cf   : > { %v769_v60 = vmul.f32 %v765_v48, %v722_v55  ;;  %v785_v63 = vmul.f32 %v781_v53, %v722_v55  ;;  %v756_v4 = vrot.slane %v721_v54, 2  ;;  %v757_v9 = vrot.slane %v722_v55, 2 }
 0x1d0   : > { %v748_v61 = vrot.slane %v744_v56, 1  ;;  %v772_v62 = vrot.slane %v768_v57, 1  ;;  %v749_v2 = vrot.slane %v745_v59, 1  ;;  %v788_v6 = vrot.slane %v784_v58, 1 }
 0x1d1   : > { %v773_v3 = vrot.slane %v769_v60, 1  ;;  %v789_v12 = vrot.slane %v785_v63, 1 }
 0x1d2   : > { %v776_v5 = vadd.f32 %v772_v62, %v768_v57  ;;  %v752_v7 = vadd.f32 %v748_v61, %v744_v56  ;;  %v753_v8 = vadd.f32 %v749_v2, %v745_v59  ;;  %v792_v18 = vadd.f32 %v788_v6, %v784_v58 }
 0x1d3   : > { %v777_v10 = vadd.f32 %v773_v3, %v769_v60  ;;  %v793_v25 = vadd.f32 %v789_v12, %v785_v63 }
 0x1d4   : > { %v778_v11 = vadd.f32 %v776_v5, %v756_v4  ;;  %v648_v0 = vpop.f32.mrf.mxu0  ;;  %v674_v13 = vpop.f32.mrf.mxu1  ;;  %v1623_v14 = vadd.f32 %v757_v9, %v753_v8  ;;  %v760_v22 = vadd.f32 %v756_v4, %v752_v7 }
 0x1d5   : > { %v779_v1 = vadd.f32 %v777_v10, %v757_v9  ;;  %v1627_v16 = vsel %vm1608_vm15, %v648_v0, 0.0  ;;  %v724_v17 = vsel %vm1612_vm0, %v674_v13, 0.0 }
 0x1d6   : > { %931 = vst [vmem:[#allocation1] sm:$0xff] %v778_v11  ;;  %v796_v19 = vrot.slane %v1627_v16, 2  ;;  %v802_v20 = vrot.slane %v1627_v16, 1  ;;  %v797_v21 = vrot.slane %v724_v17, 2  ;;  %v922_v23 = vrot.slane %v1623_v14, 7 }
 0x1d7   : > { %932 = vst [vmem:[#allocation1 + $0x9] sm:$0xff] %v779_v1  ;;  %v803_v24 = vrot.slane %v724_v17, 1  ;;  %v857_v36 = vrot.slane %v724_v17, 3  ;;  %v856_v40 = vrot.slane %v1627_v16, 3 }
 0x1d8   : > { %v800_v26 = vadd.f32 %v796_v19, %v792_v18  ;;  %v808_v28 = vmul.f32 %v802_v20, %v778_v11  ;;  %v923_v29 = vsel %vm693_vm14, %v760_v22, %v922_v23  ;;  %v801_v33 = vadd.f32 %v797_v21, %v793_v25 }
 0x1d9   : > { %v925_v30 = vsel %vm737_vm10, %v923_v29, -1.0  ;;  %v806_v34 = vmul.f32 %v802_v20, %v760_v22  ;;  %v809_v35 = vmul.f32 %v803_v24, %v779_v1  ;;  %v807_v41 = vmul.f32 %v803_v24, %v1623_v14 }
 0x1da   : > { %v812_v31 = vrot.slane %v808_v28, 3  ;;  %v818_v32 = vmul.f32 %v802_v20, %v800_v26  ;;  %1186 = vst.msk [vmem:[%s1562_s5 + $0x5] ss:$8 sm:$0x3] %vm1509_vm1, %v925_v30  ;;  %v819_v37 = vmul.f32 %v803_v24, %v801_v33  ;;  %v831_v46 = vmul.f32 %v797_v21, %v779_v1 }
 0x1db   : > { %v813_v42 = vrot.slane %v809_v35, 3  ;;  %v863_v53 = vmul.f32 %v857_v36, %v779_v1  ;;  %v830_v54 = vmul.f32 %v796_v19, %v778_v11  ;;  %v862_v57 = vmul.f32 %v856_v40, %v778_v11 }
 0x1dc   : > { %v651_v38 = vpop.f32.mrf.mxu0  ;;  %v816_v39 = vadd.f32 %v812_v31, %v806_v34  ;;  %v822_v43 = vrot.slane %v818_v32, 6  ;;  %v823_v45 = vrot.slane %v819_v37, 6  ;;  %v677_v48 = vpop.f32.mrf.mxu1  ;;  %v835_v60 = vrot.slane %v831_v46, 3 }
 0x1dd   : > { %v725_v47 = vsel %vm1608_vm15, %v651_v38, 0.0  ;;  %v817_v51 = vadd.f32 %v813_v42, %v807_v41  ;;  %v726_v50 = vsel %vm1612_vm0, %v677_v48, 0.0  ;;  %v867_v63 = vrot.slane %v863_v53, 3 }
 0x1de   : > { %v934_v44 = vld [vmem:[#allocation1 + $0x3] ss:$9 sm:$0xff]  ;;  %v842_v55 = vrot.slane %v725_v47, 2  ;;  %v872_v56 = vrot.slane %v725_v47, 3  ;;  %v826_v59 = vadd.f32 %v822_v43, %v816_v39  ;;  %v843_v62 = vrot.slane %v726_v50, 2 }
 0x1df   : > { %v936_v49 = vsel %vm737_vm10, %v934_v44, -1.0  ;;  %942 = vst [vmem:[#allocation1] sm:$0xff] %v800_v26  ;;  %v827_v58 = vadd.f32 %v823_v45, %v817_v51  ;;  %v873_v4 = vrot.slane %v726_v50, 3  ;;  %v828_v5 = vmul.f32 %v796_v19, %v760_v22 }
 0x1e0   : > { %1187 = vst.msk [vmem:[%s1562_s5 + $0x6] ss:$8 sm:$0x3] %vm1509_vm1, %v936_v49  ;;  %v846_v61 = vmul.f32 %v842_v55, %v800_v26  ;;  %v876_v3 = vmul.f32 %v872_v56, %v800_v26  ;;  %v834_v6 = vrot.slane %v830_v54, 3  ;;  %v829_v7 = vmul.f32 %v797_v21, %v1623_v14 }
 0x1e1   : > { %943 = vst [vmem:[#allocation1 + $0x9] sm:$0xff] %v801_v33  ;;  %v888_v2 = vrot.slane %v827_v58, 7  ;;  %v847_v8 = vmul.f32 %v843_v62, %v801_v33  ;;  %v866_v9 = vrot.slane %v862_v57, 3  ;;  %v861_v10 = vmul.f32 %v857_v36, %v1623_v14 }
 0x1e2   : > { %v877_v11 = vmul.f32 %v873_v4, %v801_v33  ;;  %v850_v0 = vrot.slane %v846_v61, 6  ;;  %v839_v13 = vadd.f32 %v835_v60, %v829_v7  ;;  %v860_v16 = vmul.f32 %v856_v40, %v760_v22 }
 0x1e3   : > { %v889_v52 = vsel %vm693_vm14, %v826_v59, %v888_v2  ;;  %v851_v1 = vrot.slane %v847_v8, 6  ;;  %v871_v17 = vadd.f32 %v867_v63, %v861_v10  ;;  %v880_v18 = vrot.slane %v876_v3, 6 }
 0x1e4   : > { %v891_v12 = vsel %vm737_vm10, %v889_v52, 1.0  ;;  %v881_v19 = vrot.slane %v877_v11, 6  ;;  %v838_v14 = vadd.f32 %v834_v6, %v828_v5  ;;  %v870_v23 = vadd.f32 %v866_v9, %v860_v16 }
 0x1e5   : > { %892 = vst.msk [vmem:[%s1562_s5] ss:$8 sm:$0x3] %vm1509_vm1, %v891_v12  ;;  %v855_v20 = vadd.f32 %v851_v1, %v839_v13 }
 0x1e6   : > { %v885_v24 = vadd.f32 %v881_v19, %v871_v17  ;;  %v854_v25 = vadd.f32 %v850_v0, %v838_v14  ;;  %v884_v28 = vadd.f32 %v880_v18, %v870_v23 }
 0x1e7   : > { %v896_v26 = vrot.slane %v855_v20, 7 }
 0x1e8   : > { %v945_v21 = vld [vmem:[#allocation1 + $0x6] ss:$9 sm:$0xff]  ;;  %v905_v29 = vrot.slane %v885_v24, 7 }
 0x1e9   : > { %v947_v22 = vsel %vm737_vm10, %v945_v21, -1.0  ;;  %v897_v30 = vsel %vm693_vm14, %v854_v25, %v896_v26 }
 0x1ea   : > { %1188 = vst.msk [vmem:[%s1562_s5 + $0x7] ss:$8 sm:$0x3] %vm1509_vm1, %v947_v22  ;;  %v899_v31 = vsel %vm737_vm10, %v897_v30, 1.0  ;;  %v906_v32 = vsel %vm693_vm14, %v884_v28, %v905_v29 }
 0x1eb   : > { %1182 = vst.msk [vmem:[%s1562_s5 + $0x1] ss:$8 sm:$0x3] %vm1509_vm1, %v899_v31  ;;  %v908_v33 = vsel %vm737_vm10, %v906_v32, 1.0 }
 0x1ec   : > { %1183 = vst.msk [vmem:[%s1562_s5 + $0x2] ss:$8 sm:$0x3] %vm1509_vm1, %v908_v33 }
 0x1ed   : > { %1322 = shalt.err (!%p1319_p13)
}
 0x1ee   : > { %1199 = dma.vmem_to_hbm [thread:$0]  (%p1452_p4), %s976_s9, 256, %s978_s10, %s955_s11  }
 0x1ef PF: > { %p1210_p0 = scmp.ge.s32.totalorder %s1377_s20, 2  ;;  %s1005_s22 = sand.u32 1, %s1357_s15  }
 0x1f0   : > { %s1006_s5 = scalar_lea.sflag [#allocation6], %s1005_s22 }
 0x1f1   : > { %p1204_p1 = pnand %p1210_p0, %p1459_p8 }
 0x1f3   : > { %p1205_p2 = pneg %p1204_p1 }
 0x1f5   : > { %1348 = dma.done.wait (%p1205_p2), %s1006_s5, 256  }
 0x1f6   : > { %1350 = vsyncadd (%p1205_p2), %s1006_s5, 4294967040  ;;  %s1016_s30 = scalar_lea.sflag [#allocation8], %s1005_s22 }
 0x1f7   : > { %1352 = dma.done.wait (%p1205_p2), %s1016_s30, 32  }
 0x1f8   : > { %1354 = vsyncadd (%p1205_p2), %s1016_s30, 4294967264  ;;  %s21_s20 = sadd.s32 1, %s1377_s20   ;;  %s1733_s15 = smov %s1361_s16 }
 0x1f9   : > { %p18_p3 = scmp.ge.s32.totalorder %s21_s20, 4   ;;  %s1734_s16 = smov %s1365_s17 }
 0x1fa   : > { %s1735_s17 = smov %s1465_s28  ;;  %s1736_s18 = smov %s1373_s19 }
 0x1fb   : > { %s1737_s19 = smov %s1739_s23  ;;  %20 = sbr.rel (!%p18_p3) target bundleno = 8 (0x8), region = 107 }
 0x200   :  { %1022 = vsyncpa [#allocation6], 1 }
 0x201   :  { %1024 = vsyncpa [#allocation6 + $0x1], 1 }
 0x202   :  { %1025 = vsyncpa [#allocation8], 1 }
 0x203   :  { %1027 = vsyncpa [#allocation8 + $0x1], 1 }

</bundles_post_ra>
